<compile_context>
chip_gen: v5e
topology: v5e:2x2
jax: 0.10.0
libtpu: 0.0.40
codegen_flags: <defaults>
</compile_context>

<pallas_src>
import jax
import jax.numpy as jnp
from jax.experimental import pallas as pl
from jax.experimental.pallas import tpu as pltpu


def _round_up(n, m):
    return ((n + m - 1) // m) * m


def tune_head_kernel(x_ref, box_ref, w1_ref, b1_ref, wb1_ref, bb1_ref,
                     w2_ref, wb2_ref, b2_ref, out_ref):
    # In-kernel bf16 cast (VPU) of the activations for the MXU; keeps the
    # HBM-side inputs in their native f32 with no extra XLA pass.
    x = x_ref[...].astype(jnp.bfloat16)
    box = box_ref[...].astype(jnp.bfloat16)

    # Branch 1: Linear(inplanes -> HIDDEN) + ReLU  (f32 accumulation / bias).
    h1 = jnp.dot(x, w1_ref[...], preferred_element_type=jnp.float32)
    h1 = jnp.maximum(h1 + b1_ref[...], 0.0)

    # Branch 2: Linear(4 -> 128) + ReLU.
    h2 = jnp.dot(box, wb1_ref[...], preferred_element_type=jnp.float32)
    h2 = jnp.maximum(h2 + bb1_ref[...], 0.0)

    # Classifier layers; the two branch biases were pre-combined into b2_ref.
    out = jnp.dot(h1.astype(jnp.bfloat16), w2_ref[...],
                  preferred_element_type=jnp.float32)
    out += jnp.dot(h2.astype(jnp.bfloat16), wb2_ref[...],
                   preferred_element_type=jnp.float32)
    out_ref[...] = (out + b2_ref[...]).astype(out_ref.dtype)


def prepare_tune_head_params(params):
    """bf16 matmul weights, f32 row-vector biases, second-layer bias pre-combined.

    Accepts PyTorch-style 1-D biases (or (1, H)); weights are (in, out) so the
    kernel computes x @ W (i.e. already transposed vs. nn.Linear storage).
    """
    (w1, b1, w2, b2, wb1, bb1, wb2, bb2) = params
    row = lambda b: jnp.reshape(b, (1, -1)).astype(jnp.float32)
    return dict(
        w1=w1.astype(jnp.bfloat16), b1=row(b1),
        wb1=wb1.astype(jnp.bfloat16), bb1=row(bb1),
        w2=w2.astype(jnp.bfloat16), wb2=wb2.astype(jnp.bfloat16),
        b2=row(b2) + row(bb2),          # out1 + out2 -> single fused bias add
    )


def _pick_batch_tile(B, block_b):
    if B > block_b:
        return block_b                    # multiple of 16 (caller contract)
    if B >= 32:
        # Keep >= 2 grid steps so both v7x TensorCores get work; multiple of 16
        # keeps bf16 vregs fully packed.
        return _round_up((B + 1) // 2, 16)
    return B                              # block == full array dim is always legal


def tune_head_forward(x, box, fused, *, block_b=512):
    """x: (B, inplanes) f32, box: (B, 4) f32 -> (B, num_classes) f32."""
    w1, b1 = fused["w1"], fused["b1"]
    wb1, bb1 = fused["wb1"], fused["bb1"]
    w2, wb2, b2 = fused["w2"], fused["wb2"], fused["b2"]

    B, inplanes = x.shape
    num_classes = w2.shape[1]
    assert block_b % 16 == 0

    tb = _pick_batch_tile(B, block_b)
    grid = (pl.cdiv(B, tb),)   # partial edge block handled by Pallas masking

    return pl.pallas_call(
        tune_head_kernel,
        out_shape=jax.ShapeDtypeStruct((B, num_classes), jnp.float32),
        grid=grid,
        in_specs=[
            pl.BlockSpec((tb, inplanes), lambda i: (i, 0)),   # x,   batch-tiled
            pl.BlockSpec((tb, 4), lambda i: (i, 0)),          # box, batch-tiled
            pl.BlockSpec(w1.shape, lambda i: (0, 0)),         # weights/biases
            pl.BlockSpec(b1.shape, lambda i: (0, 0)),         # stay VMEM-resident
            pl.BlockSpec(wb1.shape, lambda i: (0, 0)),        # (constant index map)
            pl.BlockSpec(bb1.shape, lambda i: (0, 0)),
            pl.BlockSpec(w2.shape, lambda i: (0, 0)),
            pl.BlockSpec(wb2.shape, lambda i: (0, 0)),
            pl.BlockSpec(b2.shape, lambda i: (0, 0)),
        ],
        out_specs=pl.BlockSpec((tb, num_classes), lambda i: (i, 0)),
        compiler_params=pltpu.CompilerParams(
            dimension_semantics=("parallel",)),
    )(x, box, w1, b1, wb1, bb1, w2, wb2, b2)


def init_params(key, inplanes, hidden, num_classes):
    """Deterministic synthetic weights (shapes match TuneHead.__init__),
    with PyTorch-style 1-D biases."""
    ks = jax.random.split(key, 8)
    s = 0.05
    # self.layers: Linear(inplanes, hidden) + ReLU + Linear(hidden, num_classes)
    w1 = s * jax.random.normal(ks[0], (inplanes, hidden), jnp.float32)
    b1 = s * jax.random.normal(ks[1], (hidden,), jnp.float32)
    w2 = s * jax.random.normal(ks[2], (hidden, num_classes), jnp.float32)
    b2 = s * jax.random.normal(ks[3], (num_classes,), jnp.float32)
    # box_fc1: Linear(4, 128); box_fc2: Linear(128, num_classes)
    wb1 = s * jax.random.normal(ks[4], (4, 128), jnp.float32)
    bb1 = s * jax.random.normal(ks[5], (128,), jnp.float32)
    wb2 = s * jax.random.normal(ks[6], (128, num_classes), jnp.float32)
    bb2 = s * jax.random.normal(ks[7], (num_classes,), jnp.float32)
    return (w1, b1, w2, b2, wb1, bb1, wb2, bb2)


def tune_head_ref(x, box, params):
    """Pure-JAX f32 reference for correctness check."""
    (w1, b1, w2, b2, wb1, bb1, wb2, bb2) = params
    h = jnp.maximum(x @ w1 + b1, 0.0)
    out1 = h @ w2 + b2
    hb = jnp.maximum(box @ wb1 + bb1, 0.0)
    out2 = hb @ wb2 + bb2
    return out1 + out2


if __name__ == "__main__":
    # Small shapes consistent with the module:
    #   batch=8, inplanes=32, config=[64] (one hidden FC+ReLU), NUM_CLASSES=16
    B, INPLANES, HIDDEN, NUM_CLASSES = 8, 32, 64, 16

    key = jax.random.PRNGKey(0)
    kx, kb, kp = jax.random.split(key, 3)
    x = jax.random.normal(kx, (B, INPLANES), jnp.float32)
    box = jax.random.uniform(kb, (B, 4), jnp.float32)   # box coords

    params = init_params(kp, INPLANES, HIDDEN, NUM_CLASSES)
    fused = prepare_tune_head_params(params)

    out = jax.block_until_ready(tune_head_forward(x, box, fused))
    ref = tune_head_ref(x, box, params)

    assert out.shape == (B, NUM_CLASSES)
    # bf16 matmul operands with f32 accumulation -> relaxed tolerance vs f32 ref.
    assert jnp.allclose(out, ref, atol=1e-2, rtol=1e-2), (
        float(jnp.max(jnp.abs(out - ref))))

    print("KERNEL_OK")
</pallas_src>

<mosaic_0001>
module attributes {stable_mosaic.version = 11 : i64} {
  func.func @tune_head_kernel(%arg0: i32, %arg1: memref<8x32xf32, #tpu.memory_space<vmem>>, %arg2: memref<8x4xf32, #tpu.memory_space<vmem>>, %arg3: memref<32x64xbf16, #tpu.memory_space<vmem>>, %arg4: memref<1x64xf32, #tpu.memory_space<vmem>>, %arg5: memref<4x128xbf16, #tpu.memory_space<vmem>>, %arg6: memref<1x128xf32, #tpu.memory_space<vmem>>, %arg7: memref<64x16xbf16, #tpu.memory_space<vmem>>, %arg8: memref<128x16xbf16, #tpu.memory_space<vmem>>, %arg9: memref<1x16xf32, #tpu.memory_space<vmem>>, %arg10: memref<8x16xf32, #tpu.memory_space<vmem>>) attributes {dimension_semantics = [#tpu.dimension_semantics<parallel>], iteration_bounds = array<i64: 1>, scalar_prefetch = 0 : i64, scratch_operands = 0 : i64, tpu.core_type = #tpu.core_type<tc>, window_params = [{transform_indices = @transform_0, window_bounds = array<i64: 8, 32>}, {transform_indices = @transform_1, window_bounds = array<i64: 8, 4>}, {pipeline_mode = #tpu.pipeline_mode<synchronous>, transform_indices = @transform_2, window_bounds = array<i64: 32, 64>}, {pipeline_mode = #tpu.pipeline_mode<synchronous>, transform_indices = @transform_3, window_bounds = array<i64: 1, 64>}, {pipeline_mode = #tpu.pipeline_mode<synchronous>, transform_indices = @transform_4, window_bounds = array<i64: 4, 128>}, {pipeline_mode = #tpu.pipeline_mode<synchronous>, transform_indices = @transform_5, window_bounds = array<i64: 1, 128>}, {pipeline_mode = #tpu.pipeline_mode<synchronous>, transform_indices = @transform_6, window_bounds = array<i64: 64, 16>}, {pipeline_mode = #tpu.pipeline_mode<synchronous>, transform_indices = @transform_7, window_bounds = array<i64: 128, 16>}, {pipeline_mode = #tpu.pipeline_mode<synchronous>, transform_indices = @transform_8, window_bounds = array<i64: 1, 16>}, {transform_indices = @transform_9, window_bounds = array<i64: 8, 16>}]} {
    %c0 = arith.constant 0 : index
    %c0_0 = arith.constant 0 : index
    %0 = vector.load %arg1[%c0, %c0_0] : memref<8x32xf32, #tpu.memory_space<vmem>>, vector<8x32xf32>
    %1 = arith.truncf %0 : vector<8x32xf32> to vector<8x32xbf16>
    %c0_1 = arith.constant 0 : index
    %c0_2 = arith.constant 0 : index
    %2 = vector.load %arg2[%c0_1, %c0_2] : memref<8x4xf32, #tpu.memory_space<vmem>>, vector<8x4xf32>
    %3 = arith.truncf %2 : vector<8x4xf32> to vector<8x4xbf16>
    %c0_3 = arith.constant 0 : index
    %c0_4 = arith.constant 0 : index
    %4 = vector.load %arg3[%c0_3, %c0_4] : memref<32x64xbf16, #tpu.memory_space<vmem>>, vector<32x64xbf16>
    %cst = arith.constant dense<0.000000e+00> : vector<8x64xf32>
    %5 = tpu.matmul %1, %4, %cst {dimension_numbers = #tpu.dot_dimension_numbers<[1], [0], [0], [1], [0, 0, 1, 1], [], []>} : vector<8x32xbf16>, vector<32x64xbf16>, vector<8x64xf32> -> vector<8x64xf32>
    %c0_5 = arith.constant 0 : index
    %c0_6 = arith.constant 0 : index
    %6 = vector.load %arg4[%c0_5, %c0_6] : memref<1x64xf32, #tpu.memory_space<vmem>>, vector<1x64xf32>
    %7 = vector.broadcast %6 : vector<1x64xf32> to vector<8x64xf32>
    %8 = arith.addf %5, %7 : vector<8x64xf32>
    %cst_7 = arith.constant 0.000000e+00 : f32
    %9 = vector.broadcast %cst_7 : f32 to vector<8x64xf32>
    %10 = arith.maximumf %8, %9 : vector<8x64xf32>
    %c0_8 = arith.constant 0 : index
    %c0_9 = arith.constant 0 : index
    %11 = vector.load %arg5[%c0_8, %c0_9] : memref<4x128xbf16, #tpu.memory_space<vmem>>, vector<4x128xbf16>
    %cst_10 = arith.constant dense<0.000000e+00> : vector<8x128xf32>
    %12 = tpu.matmul %3, %11, %cst_10 {dimension_numbers = #tpu.dot_dimension_numbers<[1], [0], [0], [1], [0, 0, 1, 1], [], []>} : vector<8x4xbf16>, vector<4x128xbf16>, vector<8x128xf32> -> vector<8x128xf32>
    %c0_11 = arith.constant 0 : index
    %c0_12 = arith.constant 0 : index
    %13 = vector.load %arg6[%c0_11, %c0_12] : memref<1x128xf32, #tpu.memory_space<vmem>>, vector<1x128xf32>
    %14 = vector.broadcast %13 : vector<1x128xf32> to vector<8x128xf32>
    %15 = arith.addf %12, %14 : vector<8x128xf32>
    %cst_13 = arith.constant 0.000000e+00 : f32
    %16 = vector.broadcast %cst_13 : f32 to vector<8x128xf32>
    %17 = arith.maximumf %15, %16 : vector<8x128xf32>
    %18 = arith.truncf %10 : vector<8x64xf32> to vector<8x64xbf16>
    %c0_14 = arith.constant 0 : index
    %c0_15 = arith.constant 0 : index
    %19 = vector.load %arg7[%c0_14, %c0_15] : memref<64x16xbf16, #tpu.memory_space<vmem>>, vector<64x16xbf16>
    %cst_16 = arith.constant dense<0.000000e+00> : vector<8x16xf32>
    %20 = tpu.matmul %18, %19, %cst_16 {dimension_numbers = #tpu.dot_dimension_numbers<[1], [0], [0], [1], [0, 0, 1, 1], [], []>} : vector<8x64xbf16>, vector<64x16xbf16>, vector<8x16xf32> -> vector<8x16xf32>
    %21 = arith.truncf %17 : vector<8x128xf32> to vector<8x128xbf16>
    %c0_17 = arith.constant 0 : index
    %c0_18 = arith.constant 0 : index
    %22 = vector.load %arg8[%c0_17, %c0_18] : memref<128x16xbf16, #tpu.memory_space<vmem>>, vector<128x16xbf16>
    %cst_19 = arith.constant dense<0.000000e+00> : vector<8x16xf32>
    %23 = tpu.matmul %21, %22, %cst_19 {dimension_numbers = #tpu.dot_dimension_numbers<[1], [0], [0], [1], [0, 0, 1, 1], [], []>} : vector<8x128xbf16>, vector<128x16xbf16>, vector<8x16xf32> -> vector<8x16xf32>
    %24 = arith.addf %20, %23 : vector<8x16xf32>
    %c0_20 = arith.constant 0 : index
    %c0_21 = arith.constant 0 : index
    %25 = vector.load %arg9[%c0_20, %c0_21] : memref<1x16xf32, #tpu.memory_space<vmem>>, vector<1x16xf32>
    %26 = vector.broadcast %25 : vector<1x16xf32> to vector<8x16xf32>
    %27 = arith.addf %24, %26 : vector<8x16xf32>
    %c0_22 = arith.constant 0 : index
    %c0_23 = arith.constant 0 : index
    %28 = vector.load %arg10[%c0_22, %c0_23] : memref<8x16xf32, #tpu.memory_space<vmem>>, vector<8x16xf32>
    tpu.vector_store %arg10[%c0_22, %c0_23], %27 {strides = array<i32>} : memref<8x16xf32, #tpu.memory_space<vmem>>, vector<8x16xf32>,
    return
  }
  func.func @transform_0(%arg0: i32) -> (i32, i32) {
    %c0_i32 = arith.constant 0 : i32
    %c0_i32_0 = arith.constant 0 : i32
    return %arg0, %c0_i32 : i32, i32
  }
  func.func @transform_1(%arg0: i32) -> (i32, i32) {
    %c0_i32 = arith.constant 0 : i32
    %c0_i32_0 = arith.constant 0 : i32
    return %arg0, %c0_i32 : i32, i32
  }
  func.func @transform_2(%arg0: i32) -> (i32, i32) {
    %c0_i32 = arith.constant 0 : i32
    %c0_i32_0 = arith.constant 0 : i32
    %c0_i32_1 = arith.constant 0 : i32
    return %c0_i32, %c0_i32_0 : i32, i32
  }
  func.func @transform_3(%arg0: i32) -> (i32, i32) {
    %c0_i32 = arith.constant 0 : i32
    %c0_i32_0 = arith.constant 0 : i32
    %c0_i32_1 = arith.constant 0 : i32
    return %c0_i32, %c0_i32_0 : i32, i32
  }
  func.func @transform_4(%arg0: i32) -> (i32, i32) {
    %c0_i32 = arith.constant 0 : i32
    %c0_i32_0 = arith.constant 0 : i32
    %c0_i32_1 = arith.constant 0 : i32
    return %c0_i32, %c0_i32_0 : i32, i32
  }
  func.func @transform_5(%arg0: i32) -> (i32, i32) {
    %c0_i32 = arith.constant 0 : i32
    %c0_i32_0 = arith.constant 0 : i32
    %c0_i32_1 = arith.constant 0 : i32
    return %c0_i32, %c0_i32_0 : i32, i32
  }
  func.func @transform_6(%arg0: i32) -> (i32, i32) {
    %c0_i32 = arith.constant 0 : i32
    %c0_i32_0 = arith.constant 0 : i32
    %c0_i32_1 = arith.constant 0 : i32
    return %c0_i32, %c0_i32_0 : i32, i32
  }
  func.func @transform_7(%arg0: i32) -> (i32, i32) {
    %c0_i32 = arith.constant 0 : i32
    %c0_i32_0 = arith.constant 0 : i32
    %c0_i32_1 = arith.constant 0 : i32
    return %c0_i32, %c0_i32_0 : i32, i32
  }
  func.func @transform_8(%arg0: i32) -> (i32, i32) {
    %c0_i32 = arith.constant 0 : i32
    %c0_i32_0 = arith.constant 0 : i32
    %c0_i32_1 = arith.constant 0 : i32
    return %c0_i32, %c0_i32_0 : i32, i32
  }
  func.func @transform_9(%arg0: i32) -> (i32, i32) {
    %c0_i32 = arith.constant 0 : i32
    %c0_i32_0 = arith.constant 0 : i32
    return %arg0, %c0_i32 : i32, i32
  }
}

</mosaic_0001>

<bundles_post_ra>
// kernel: tpu_custom_call.1
= control target key start
LH: loop header
LB: loop body
LE: loop exit
PB: predicated region body
PF: predicated region fallthrough
CT: control target
= control target key end

     0   :  { %vm85_vm0 = vcmask 1041408   ;;  %vm81_vm1 = vcmask 31744   ;;  %s471_s0 = inlined_call_operand.vmem [shape: f32[8,32], index: 0, kind: input, shape index: {}]   ;;  %s472_s1 = inlined_call_operand.vmem [shape: f32[8,4], index: 1, kind: input, shape index: {}]   ;;  %s473_s2 = inlined_call_operand.vmem [shape: bf16[32,64], index: 2, kind: input, shape index: {}]   ;;  %s474_s3 = inlined_call_operand.vmem [shape: f32[1,64], index: 3, kind: input, shape index: {}]   ;;  %s475_s4 = inlined_call_operand.vmem [shape: bf16[4,128], index: 4, kind: input, shape index: {}]   ;;  %s476_s5 = inlined_call_operand.vmem [shape: f32[1,128], index: 5, kind: input, shape index: {}]   ;;  %s477_s6 = inlined_call_operand.vmem [shape: bf16[64,16], index: 6, kind: input, shape index: {}]   ;;  %s478_s7 = inlined_call_operand.vmem [shape: bf16[128,16], index: 7, kind: input, shape index: {}]   ;;  %s479_s8 = inlined_call_operand.vmem [shape: f32[1,16], index: 8, kind: input, shape index: {}]   ;;  %s480_s9 = inlined_call_operand.hbm [shape: f32[8,16], index: 9, kind: output, shape index: {}]  }
   0x1   :  { %v76_v0 = vld [vmem:[%s475_s4] sm:$0x3]  ;;  %v314_v1 = vld [vmem:[%s473_s2 + $0x8] sm:$0xff]  ;;  %v326_v5 = vld [vmem:[%s478_s7 + $0x38] sm:$0xff] }
   0x2   :  { %v36_v2 = vld [vmem:[%s472_s1] sm:$0xff]  ;;  %v87_v3 = vsel %vm85_vm0, %v76_v0, 0  ;;  %68 = vmatpush.bf16.msra.mxu0 %v314_v1  ;;  %177 = vmatpush.bf16.msra.mxu2 %v326_v5  ;;  %v325_v8 = vld [vmem:[%s478_s7 + $0x30] sm:$0xff]  ;;  %v318_v9 = vld [vmem:[%s477_s6 + $0x18] sm:$0xff] }
   0x3   :  { %v37_v4 = vpack.c.bf16 %v36_v2, %v36_v2  ;;  %96 = vmatpush.bf16.msra.mxu1 %v87_v3  ;;  %v313_v6 = vld [vmem:[%s473_s2] sm:$0xff]  ;;  %222 = vmatpush.bf16.msra.mxu3 %v318_v9 }
   0x4   :  { %v34_v7 = vld [vmem:[%s471_s0] sm:$0xff] }
   0x5   :  { %v35_v10 = vpack.c.bf16 %v34_v7, %v34_v7 }
   0x6   :  { %263 = vmatmul.msk.bf16.vlgmr.msra.gmra.mxu1 %vm81_vm1, %v37_v4 }
   0x7   :  { %14 = vsyncpa [#allocation3], 0  ;;  %69 = vmatpush.bf16.msra.mxu0 %v313_v6  ;;  %vm58_vm2 = vcmask 261120   ;;  %178 = vmatpush.bf16.msra.mxu2 %v325_v8  ;;  %v324_v11 = vld [vmem:[%s478_s7 + $0x28] sm:$0xff]  ;;  %v323_v12 = vld [vmem:[%s478_s7 + $0x20] sm:$0xff]  ;;  %vm214_vm3 = vcmask 523264  }
   0x8   :  { %v322_v13 = vld [vmem:[%s478_s7 + $0x18] sm:$0xff]  ;;  %v321_v14 = vld [vmem:[%s478_s7 + $0x10] sm:$0xff]  ;;  %v320_v15 = vld [vmem:[%s478_s7 + $0x8] sm:$0xff]  ;;  %s245_s22 = sshll.u32 %s480_s9, 4  ;;  %vm236_vm4 = vcmask 130048   ;;  %s246_s22 = int_to_ptr.hbm [resolvable:$true] %s245_s22 }
   0x9   :  { %v317_v16 = vld [vmem:[%s477_s6 + $0x10] sm:$0xff]  ;;  %v319_v17 = vld [vmem:[%s478_s7] sm:$0xff]  ;;  %v316_v18 = vld [vmem:[%s477_s6 + $0x8] sm:$0xff]  ;;  %s357_s7 = smov [#allocation2]  }
   0xa   :  { %262 = vmatmul.msk.bf16.vlgmr.msra.gmra.mxu0 %vm58_vm2, %v35_v10  ;;  %223 = vmatpush.bf16.msra.mxu3 %v317_v16  ;;  %v315_v19 = vld [vmem:[%s477_s6] sm:$0xff]  ;;  %s243_s1 = sshll.u32 %s357_s7, 4  ;;  %s244_s1 = int_to_ptr.vmem [resolvable:$true] %s243_s1 }
   0xb   :  { %179 = vmatpush.bf16.msra.mxu2 %v324_v11  ;;  %v328_v20 = vld [vmem:[%s476_s5] ss:$0 sm:$0xff] }
   0xc   :  { %v329_v23 = vld [vmem:[%s474_s3] ss:$0 sm:$0xff] }
   0xd   :  { %v330_v33 = vld [vmem:[%s479_s8] ss:$0 sm:$0xff] }
   0xe   :  { %224 = vmatpush.bf16.msra.mxu3 %v316_v18 }
   0xf   :  { %180 = vmatpush.bf16.msra.mxu2 %v323_v12 }
  0x12   :  { %225 = vmatpush.bf16.msra.mxu3 %v315_v19 }
  0x13   :  { %181 = vmatpush.bf16.msra.mxu2 %v322_v13 }
  0x17   :  { %182 = vmatpush.bf16.msra.mxu2 %v321_v14 }
  0x1b   :  { %183 = vmatpush.bf16.msra.mxu2 %v320_v15 }
  0x1f   :  { %184 = vmatpush.bf16.msra.mxu2 %v319_v17 }
  0x83   :  { %v98_v21 = vpop.f32.mrf.mxu1 }
  0x84   :  { %v99_v22 = vadd.f32 %v328_v20, %v98_v21 }
  0x86   :  { %v102_v24 = vmax.f32 %v99_v22, 0.0 }
  0x87   :  { %v71_v25 = vpop.f32.mrf.mxu0 }
  0x88   :  { %v72_v26 = vadd.f32 %v329_v23, %v71_v25  ;;  %v112_v27 = vpack.c.bf16 %v102_v24, %v102_v24 }
  0x8a   :  { %v75_v28 = vmax.f32 %v72_v26, 0.0  ;;  %185 = vmatmul.bf16.vlgmr.msra.gmra.mxu2 %v112_v27 }
  0x8b   :  { %v100_v29 = vpop.f32.mrf.mxu1 }
  0x8c   :  { %v103_v30 = vpack.c.bf16 %v75_v28, %v75_v28 }
  0x8e   :  { %312 = vmatmul.msk.bf16.vlgmr.msra.gmra.mxu3 %vm214_vm3, %v103_v30 }
  0x8f   :  { %v73_v31 = vpop.f32.mrf.mxu0 }
 0x10d   :  { %v186_v32 = vpop.f32.mrf.mxu2 }
 0x111   :  { %v227_v34 = vpop.f32.mrf.mxu3 }
 0x112   :  { %v228_v35 = vadd.f32 %v227_v34, %v186_v32 }
 0x114   :  { %v235_v36 = vadd.f32 %v330_v33, %v228_v35 }
 0x115   :  { %v188_v37 = vpop.f32.mrf.mxu2 }
 0x116   :  { %237 = vst.msk [vmem:[#allocation2] sm:$0xff] %vm236_vm4, %v235_v36 }
 0x117   :  { %248 = dma.vmem_to_hbm [thread:$0]  %s244_s1, 128, %s246_s22, [#allocation3]  }
 0x119   :  { %v229_v38 = vpop.f32.mrf.mxu3 }
 0x11a   :  { %355 = dma.done.wait [#allocation3], 128  }
 0x11b   :  { %356 = vsyncadd [#allocation3], 4294967168 }
 0x11c   :  { %253 = vsyncpa [#allocation3], 1 }

</bundles_post_ra>
